<compile_context>
chip_gen: v5e
topology: v5e:2x2
jax: 0.10.0
libtpu: 0.0.40
codegen_flags: <defaults>
</compile_context>

<pallas_src>
import jax
import jax.numpy as jnp
from jax.experimental import pallas as pl
from jax.experimental.pallas import tpu as pltpu

# Lane alignment for feature dims.  256 is MXU-native on v6e/v7x, but padding
# small true widths to 256 wastes more compute than it saves; keep 128.
_FEAT_ALIGN = 128


def _round_up(x, m):
    return (x + m - 1) // m * m


# ---------------------------------------------------------------------------
# Fused kernel: pool + all linear layers in one body
# ---------------------------------------------------------------------------

def _make_fused_kernel(num_layers):
    """kernel(embed, mask, w0, b0, ..., w_{L-1}, b_{L-1}, out)."""

    def kernel(*refs):
        embed_ref = refs[0]                      # (tb, S, E)       bf16
        mask_ref = refs[1]                       # (tb, S, 1)       f32
        out_ref = refs[2 + 2 * num_layers]       # (tb, OUT_pad)    f32

        # --- masked mean pool ---
        # bf16 arrives over DMA (half the HBM bytes); multiply/sum runs in f32
        # on the VPU (v5e has no bf16 VALU), exact divide on the tiny (tb,1) den.
        e = embed_ref[...].astype(jnp.float32)
        m = mask_ref[...]
        num = jnp.sum(e * m, axis=1)             # (tb, E)  f32
        den = jnp.sum(m, axis=1)                 # (tb, 1)  f32
        x = (num / den).astype(jnp.bfloat16)     # pooled activation, bf16 once

        # --- MLP stack: bf16 matmuls on the MXU, f32 accumulate + epilogue ---
        for i in range(num_layers):
            w_ref = refs[2 + 2 * i]              # (K, N_pad) bf16
            b_ref = refs[3 + 2 * i]              # (1, N_pad) f32
            y = jnp.dot(x, w_ref[...], preferred_element_type=jnp.float32)
            y = y + b_ref[...]
            if i < num_layers - 1:
                x = jnp.maximum(y, 0.0).astype(jnp.bfloat16)
            else:
                x = y                            # final layer stays f32

        out_ref[...] = x.astype(out_ref.dtype)

    return kernel


# ---------------------------------------------------------------------------
# VMEM-budget-aware tiling helpers
# ---------------------------------------------------------------------------

def _vmem_capacity_bytes():
    try:
        return int(pltpu.get_tpu_info().vmem_capacity_bytes)
    except Exception:
        return 64 * 1024 * 1024   # conservative fallback (v7x per-core VMEM)


def _choose_tb(B, S, E, const_bytes, max_feat_pad, out_pad, budget):
    """Pick the batch-tile size from the actual VMEM budget."""
    tb = min(_round_up(B, 8), 512)
    # Guarantee >= 2 grid steps when the batch allows, so both v7x TensorCores
    # get work under dimension_semantics=("parallel",).  Costs ~0.35us on 1-TC.
    if B > 8:
        tb = min(tb, _round_up((B + 1) // 2, 8))
    while True:
        per_step = (
            2 * tb * S * E * 2          # double-buffered bf16 embed tile
            + 2 * tb * S * 4            # double-buffered f32 mask tile
            + 2 * tb * out_pad * 4      # double-buffered f32 output tile
            + tb * S * E * 8            # f32 upcast / product temporaries
            + tb * max_feat_pad * 8     # activation temporaries
        )
        if const_bytes + per_step <= budget or tb <= 8:
            return tb
        tb = max(8, _round_up(tb // 2, 8))


# ---------------------------------------------------------------------------
# Wrapper: pad batch only, set up grid, slice logical result
# ---------------------------------------------------------------------------

def fused_mlp_forward(input_embed, input_mask, weights_bf16, biases_f32,
                      out_features):
    num_layers = len(weights_bf16)

    if input_mask is None:
        # Pre-pooled [B, E] input: treat as S=1 with a mask of ones.
        input_embed = input_embed[:, None, :]
        input_mask = jnp.ones(input_embed.shape[:2], dtype=jnp.float32)

    B, S, E = input_embed.shape
    OUT_pad = weights_bf16[-1].shape[1]
    max_feat_pad = max(w.shape[1] for w in weights_bf16)
    const_bytes = (sum(int(w.size) * 2 for w in weights_bf16)
                   + sum(int(b.size) * 4 for b in biases_f32))

    cap = _vmem_capacity_bytes()
    # ~100 MiB on 128-MiB parts (v5e/v6e), ~50 MiB on 64-MiB v7x.
    vmem_limit = max(32 * 1024 * 1024, min(int(cap * 0.78), 100 * 1024 * 1024))
    tb = _choose_tb(B, S, E, const_bytes, max_feat_pad, OUT_pad, vmem_limit)
    B_pad = _round_up(B, tb)

    # Batch-only padding; cast to bf16 once (pad+cast fuse into one XLA op).
    # No E padding of the big embed tensor anymore.
    embed_p = jnp.pad(input_embed,
                      ((0, B_pad - B), (0, 0), (0, 0))).astype(jnp.bfloat16)
    # Mask pre-shaped [B, S, 1]; padded rows get mask = 1.0 so their
    # denominator is S (no 0/0 -> nan in discarded rows).
    mask_p = jnp.pad(input_mask.astype(jnp.float32)[:, :, None],
                     ((0, B_pad - B), (0, 0), (0, 0)), constant_values=1.0)

    in_specs = [
        pl.BlockSpec((tb, S, E), lambda i: (i, 0, 0)),
        pl.BlockSpec((tb, S, 1), lambda i: (i, 0, 0)),
    ]
    args = [embed_p, mask_p]
    for w, b in zip(weights_bf16, biases_f32):
        # Constant index map -> single-buffered: halves resident weight VMEM.
        in_specs.append(pl.BlockSpec(w.shape, lambda i: (0, 0),
                                     pipeline_mode=pl.Buffered(1)))
        in_specs.append(pl.BlockSpec(b.shape, lambda i: (0, 0),
                                     pipeline_mode=pl.Buffered(1)))
        args.extend([w, b])

    flops = 2 * B_pad * S * E
    for w in weights_bf16:
        flops += 2 * B_pad * w.shape[0] * w.shape[1]
    bytes_accessed = (int(embed_p.size) * 2 + int(mask_p.size) * 4
                      + const_bytes + B_pad * OUT_pad * 4)

    out_p = pl.pallas_call(
        _make_fused_kernel(num_layers),
        out_shape=jax.ShapeDtypeStruct((B_pad, OUT_pad), jnp.float32),
        grid=(B_pad // tb,),
        in_specs=in_specs,
        out_specs=pl.BlockSpec((tb, OUT_pad), lambda i: (i, 0)),
        compiler_params=pltpu.CompilerParams(
            dimension_semantics=("parallel",),
            vmem_limit_bytes=vmem_limit,
        ),
        cost_estimate=pl.CostEstimate(flops=int(flops), transcendentals=0,
                                      bytes_accessed=int(bytes_accessed)),
    )(*args)

    return out_p[:B, :out_features]


# ---------------------------------------------------------------------------
# Model
# ---------------------------------------------------------------------------

class MLPModelPallas:
    """Pallas port of MLPModel (eval mode)."""

    def __init__(self, embed_size, hidden_size, output_size, dropout, key):
        if not hasattr(hidden_size, "__len__"):
            hidden_size = [hidden_size]
        sizes = [embed_size] + list(hidden_size) + [output_size]
        self.output_size = output_size
        self.dropout = dropout  # eval mode -> identity

        self.weights = []          # f32 logical parameters (reference)
        self.biases = []
        self.weights_padded = []   # bf16; N padded to 128, K padded except layer 0
        self.biases_padded = []    # f32;  N padded to 128
        for i in range(len(sizes) - 1):
            key, wk, bk = jax.random.split(key, 3)
            fan_in = sizes[i]
            bound = 1.0 / (fan_in ** 0.5)
            w = jax.random.uniform(wk, (sizes[i], sizes[i + 1]),
                                   minval=-bound, maxval=bound, dtype=jnp.float32)
            b = jax.random.uniform(bk, (1, sizes[i + 1]),
                                   minval=-bound, maxval=bound, dtype=jnp.float32)
            self.weights.append(w)
            self.biases.append(b)

            # First layer keeps its true K (= embed_size): the pooled activation
            # enters the kernel unpadded, so no wrapper-side E padding is needed.
            in_pad = sizes[i] if i == 0 else _round_up(sizes[i], _FEAT_ALIGN)
            out_pad = _round_up(sizes[i + 1], _FEAT_ALIGN)
            w_p = jnp.pad(w, ((0, in_pad - sizes[i]), (0, out_pad - sizes[i + 1])))
            b_p = jnp.pad(b, ((0, 0), (0, out_pad - sizes[i + 1])))
            self.weights_padded.append(w_p.astype(jnp.bfloat16))
            self.biases_padded.append(b_p)

    def __call__(self, input_embed, input_mask=None):
        if input_mask is None:
            lead = input_embed.shape[:-1]
            x2d = input_embed.reshape(-1, input_embed.shape[-1])
            out = fused_mlp_forward(x2d, None, self.weights_padded,
                                    self.biases_padded, self.output_size)
            return out.reshape(*lead, self.output_size)
        return fused_mlp_forward(input_embed, input_mask, self.weights_padded,
                                 self.biases_padded, self.output_size)


# ---------------------------------------------------------------------------
# Pure-JAX f32 reference for a correctness spot-check
# ---------------------------------------------------------------------------

def reference_forward(model, input_embed, input_mask=None):
    x = input_embed
    if input_mask is not None:
        x = (x * input_mask[:, :, None]).sum(1) / input_mask.sum(-1)[:, None]
    for i in range(len(model.weights) - 1):
        x = jnp.maximum(x @ model.weights[i] + model.biases[i], 0.0)
    return x @ model.weights[-1] + model.biases[-1]


if __name__ == "__main__":
    key = jax.random.PRNGKey(0)
    key, k_embed, k_mask, k_model = jax.random.split(key, 4)

    B, S, E = 2, 8, 32
    hidden = [64, 32]
    out_size = 16

    input_embed = jax.random.normal(k_embed, (B, S, E), dtype=jnp.float32)
    # Deterministic mask with at least one valid position per row.
    mask_bits = (jax.random.uniform(k_mask, (B, S)) > 0.3).astype(jnp.float32)
    mask_bits = mask_bits.at[:, 0].set(1.0)

    model = MLPModelPallas(E, hidden, out_size, dropout=0.1, key=k_model)

    out = jax.block_until_ready(model(input_embed, mask_bits))
    ref = reference_forward(model, input_embed, mask_bits)

    assert out.shape == (B, out_size)
    # Kernel quantizes embed + activations + weights to bf16 on the MXU path;
    # compare vs the f32 reference with a tolerance covering bf16 error.
    assert jnp.allclose(out, ref, atol=2e-2, rtol=2e-2), "mismatch vs reference"

    print("KERNEL_OK")
</pallas_src>

<mosaic_0001>
module attributes {stable_mosaic.version = 11 : i64} {
  func.func @kernel(%arg0: i32, %arg1: memref<8x8x32xbf16, #tpu.memory_space<vmem>>, %arg2: memref<8x8x1xf32, #tpu.memory_space<vmem>>, %arg3: memref<32x128xbf16, #tpu.memory_space<vmem>>, %arg4: memref<1x128xf32, #tpu.memory_space<vmem>>, %arg5: memref<128x128xbf16, #tpu.memory_space<vmem>>, %arg6: memref<1x128xf32, #tpu.memory_space<vmem>>, %arg7: memref<128x128xbf16, #tpu.memory_space<vmem>>, %arg8: memref<1x128xf32, #tpu.memory_space<vmem>>, %arg9: memref<8x128xf32, #tpu.memory_space<vmem>>) attributes {dimension_semantics = [#tpu.dimension_semantics<parallel>], iteration_bounds = array<i64: 1>, scalar_prefetch = 0 : i64, scratch_operands = 0 : i64, tpu.core_type = #tpu.core_type<tc>, window_params = [{transform_indices = @transform_0, window_bounds = array<i64: 8, 8, 32>}, {transform_indices = @transform_1, window_bounds = array<i64: 8, 8, 1>}, {pipeline_mode = #tpu.pipeline_mode<synchronous>, transform_indices = @transform_2, window_bounds = array<i64: 32, 128>}, {pipeline_mode = #tpu.pipeline_mode<synchronous>, transform_indices = @transform_3, window_bounds = array<i64: 1, 128>}, {pipeline_mode = #tpu.pipeline_mode<synchronous>, transform_indices = @transform_4, window_bounds = array<i64: 128, 128>}, {pipeline_mode = #tpu.pipeline_mode<synchronous>, transform_indices = @transform_5, window_bounds = array<i64: 1, 128>}, {pipeline_mode = #tpu.pipeline_mode<synchronous>, transform_indices = @transform_6, window_bounds = array<i64: 128, 128>}, {pipeline_mode = #tpu.pipeline_mode<synchronous>, transform_indices = @transform_7, window_bounds = array<i64: 1, 128>}, {transform_indices = @transform_8, window_bounds = array<i64: 8, 128>}]} {
    %c0 = arith.constant 0 : index
    %c0_0 = arith.constant 0 : index
    %c0_1 = arith.constant 0 : index
    %0 = vector.load %arg1[%c0, %c0_0, %c0_1] : memref<8x8x32xbf16, #tpu.memory_space<vmem>>, vector<8x8x32xbf16>
    %1 = arith.extf %0 : vector<8x8x32xbf16> to vector<8x8x32xf32>
    %c0_2 = arith.constant 0 : index
    %c0_3 = arith.constant 0 : index
    %c0_4 = arith.constant 0 : index
    %2 = vector.load %arg2[%c0_2, %c0_3, %c0_4] : memref<8x8x1xf32, #tpu.memory_space<vmem>>, vector<8x8x1xf32>
    %3 = vector.broadcast %2 : vector<8x8x1xf32> to vector<8x8x32xf32>
    %4 = arith.mulf %1, %3 : vector<8x8x32xf32>
    %cst = arith.constant dense<0.000000e+00> : vector<8x32xf32>
    %5 = vector.multi_reduction <add>, %4, %cst [1] : vector<8x8x32xf32> to vector<8x32xf32>
    %cst_5 = arith.constant dense<0.000000e+00> : vector<8x1xf32>
    %6 = vector.multi_reduction <add>, %2, %cst_5 [1] : vector<8x8x1xf32> to vector<8x1xf32>
    %7 = vector.broadcast %6 : vector<8x1xf32> to vector<8x32xf32>
    %8 = arith.divf %5, %7 : vector<8x32xf32>
    %9 = arith.truncf %8 : vector<8x32xf32> to vector<8x32xbf16>
    %c0_6 = arith.constant 0 : index
    %c0_7 = arith.constant 0 : index
    %10 = vector.load %arg3[%c0_6, %c0_7] : memref<32x128xbf16, #tpu.memory_space<vmem>>, vector<32x128xbf16>
    %cst_8 = arith.constant dense<0.000000e+00> : vector<8x128xf32>
    %11 = tpu.matmul %9, %10, %cst_8 {dimension_numbers = #tpu.dot_dimension_numbers<[1], [0], [0], [1], [0, 0, 1, 1], [], []>} : vector<8x32xbf16>, vector<32x128xbf16>, vector<8x128xf32> -> vector<8x128xf32>
    %c0_9 = arith.constant 0 : index
    %c0_10 = arith.constant 0 : index
    %12 = vector.load %arg4[%c0_9, %c0_10] : memref<1x128xf32, #tpu.memory_space<vmem>>, vector<1x128xf32>
    %13 = vector.broadcast %12 : vector<1x128xf32> to vector<8x128xf32>
    %14 = arith.addf %11, %13 : vector<8x128xf32>
    %cst_11 = arith.constant 0.000000e+00 : f32
    %15 = vector.broadcast %cst_11 : f32 to vector<8x128xf32>
    %16 = arith.maximumf %14, %15 : vector<8x128xf32>
    %17 = arith.truncf %16 : vector<8x128xf32> to vector<8x128xbf16>
    %c0_12 = arith.constant 0 : index
    %c0_13 = arith.constant 0 : index
    %18 = vector.load %arg5[%c0_12, %c0_13] : memref<128x128xbf16, #tpu.memory_space<vmem>>, vector<128x128xbf16>
    %cst_14 = arith.constant dense<0.000000e+00> : vector<8x128xf32>
    %19 = tpu.matmul %17, %18, %cst_14 {dimension_numbers = #tpu.dot_dimension_numbers<[1], [0], [0], [1], [0, 0, 1, 1], [], []>} : vector<8x128xbf16>, vector<128x128xbf16>, vector<8x128xf32> -> vector<8x128xf32>
    %c0_15 = arith.constant 0 : index
    %c0_16 = arith.constant 0 : index
    %20 = vector.load %arg6[%c0_15, %c0_16] : memref<1x128xf32, #tpu.memory_space<vmem>>, vector<1x128xf32>
    %21 = vector.broadcast %20 : vector<1x128xf32> to vector<8x128xf32>
    %22 = arith.addf %19, %21 : vector<8x128xf32>
    %cst_17 = arith.constant 0.000000e+00 : f32
    %23 = vector.broadcast %cst_17 : f32 to vector<8x128xf32>
    %24 = arith.maximumf %22, %23 : vector<8x128xf32>
    %25 = arith.truncf %24 : vector<8x128xf32> to vector<8x128xbf16>
    %c0_18 = arith.constant 0 : index
    %c0_19 = arith.constant 0 : index
    %26 = vector.load %arg7[%c0_18, %c0_19] : memref<128x128xbf16, #tpu.memory_space<vmem>>, vector<128x128xbf16>
    %cst_20 = arith.constant dense<0.000000e+00> : vector<8x128xf32>
    %27 = tpu.matmul %25, %26, %cst_20 {dimension_numbers = #tpu.dot_dimension_numbers<[1], [0], [0], [1], [0, 0, 1, 1], [], []>} : vector<8x128xbf16>, vector<128x128xbf16>, vector<8x128xf32> -> vector<8x128xf32>
    %c0_21 = arith.constant 0 : index
    %c0_22 = arith.constant 0 : index
    %28 = vector.load %arg8[%c0_21, %c0_22] : memref<1x128xf32, #tpu.memory_space<vmem>>, vector<1x128xf32>
    %29 = vector.broadcast %28 : vector<1x128xf32> to vector<8x128xf32>
    %30 = arith.addf %27, %29 : vector<8x128xf32>
    %c0_23 = arith.constant 0 : index
    %c0_24 = arith.constant 0 : index
    %31 = vector.load %arg9[%c0_23, %c0_24] : memref<8x128xf32, #tpu.memory_space<vmem>>, vector<8x128xf32>
    tpu.vector_store %arg9[%c0_23, %c0_24], %30 {strides = array<i32>} : memref<8x128xf32, #tpu.memory_space<vmem>>, vector<8x128xf32>,
    return
  }
  func.func @transform_0(%arg0: i32) -> (i32, i32, i32) {
    %c0_i32 = arith.constant 0 : i32
    %c0_i32_0 = arith.constant 0 : i32
    %c0_i32_1 = arith.constant 0 : i32
    return %arg0, %c0_i32, %c0_i32_0 : i32, i32, i32
  }
  func.func @transform_1(%arg0: i32) -> (i32, i32, i32) {
    %c0_i32 = arith.constant 0 : i32
    %c0_i32_0 = arith.constant 0 : i32
    %c0_i32_1 = arith.constant 0 : i32
    return %arg0, %c0_i32, %c0_i32_0 : i32, i32, i32
  }
  func.func @transform_2(%arg0: i32) -> (i32, i32) {
    %c0_i32 = arith.constant 0 : i32
    %c0_i32_0 = arith.constant 0 : i32
    %c0_i32_1 = arith.constant 0 : i32
    return %c0_i32, %c0_i32_0 : i32, i32
  }
  func.func @transform_3(%arg0: i32) -> (i32, i32) {
    %c0_i32 = arith.constant 0 : i32
    %c0_i32_0 = arith.constant 0 : i32
    %c0_i32_1 = arith.constant 0 : i32
    return %c0_i32, %c0_i32_0 : i32, i32
  }
  func.func @transform_4(%arg0: i32) -> (i32, i32) {
    %c0_i32 = arith.constant 0 : i32
    %c0_i32_0 = arith.constant 0 : i32
    %c0_i32_1 = arith.constant 0 : i32
    return %c0_i32, %c0_i32_0 : i32, i32
  }
  func.func @transform_5(%arg0: i32) -> (i32, i32) {
    %c0_i32 = arith.constant 0 : i32
    %c0_i32_0 = arith.constant 0 : i32
    %c0_i32_1 = arith.constant 0 : i32
    return %c0_i32, %c0_i32_0 : i32, i32
  }
  func.func @transform_6(%arg0: i32) -> (i32, i32) {
    %c0_i32 = arith.constant 0 : i32
    %c0_i32_0 = arith.constant 0 : i32
    %c0_i32_1 = arith.constant 0 : i32
    return %c0_i32, %c0_i32_0 : i32, i32
  }
  func.func @transform_7(%arg0: i32) -> (i32, i32) {
    %c0_i32 = arith.constant 0 : i32
    %c0_i32_0 = arith.constant 0 : i32
    %c0_i32_1 = arith.constant 0 : i32
    return %c0_i32, %c0_i32_0 : i32, i32
  }
  func.func @transform_8(%arg0: i32) -> (i32, i32) {
    %c0_i32 = arith.constant 0 : i32
    %c0_i32_0 = arith.constant 0 : i32
    return %arg0, %c0_i32 : i32, i32
  }
}

</mosaic_0001>

<bundles_post_ra>
// kernel: tpu_custom_call.1
= control target key start
LH: loop header
LB: loop body
LE: loop exit
PB: predicated region body
PF: predicated region fallthrough
CT: control target
= control target key end

     0   :  { %13 = vsyncpa [#allocation3], 0  ;;  %s1282_s0 = inlined_call_operand.hbm [shape: bf16[8,8,32], index: 0, kind: input, shape index: {}]   ;;  %s1283_s1 = inlined_call_operand.vmem [shape: f32[8,8,1], index: 1, kind: input, shape index: {}]   ;;  %s1284_s2 = inlined_call_operand.hbm [shape: bf16[32,128], index: 2, kind: input, shape index: {}]   ;;  %s1285_s3 = inlined_call_operand.vmem [shape: f32[1,128], index: 3, kind: input, shape index: {}]   ;;  %s1286_s4 = inlined_call_operand.vmem [shape: bf16[128,128], index: 4, kind: input, shape index: {}]   ;;  %s1287_s5 = inlined_call_operand.vmem [shape: f32[1,128], index: 5, kind: input, shape index: {}]   ;;  %s1288_s6 = inlined_call_operand.hbm [shape: bf16[128,128], index: 6, kind: input, shape index: {}]   ;;  %s1289_s7 = inlined_call_operand.vmem [shape: f32[1,128], index: 7, kind: input, shape index: {}]   ;;  %s1290_s8 = inlined_call_operand.hbm [shape: f32[8,128], index: 8, kind: output, shape index: {}]  }
   0x1   :  { %14 = vsyncpa [#allocation6], 0 }
   0x2   :  { %15 = vsyncpa [#allocation4], 0  ;;  %s35_s29 = sshll.u32 %s1284_s2, 4  ;;  %s925_s30 = smov [#allocation5]   ;;  %s36_s29 = int_to_ptr.hbm [resolvable:$true] %s35_s29 }
   0x3   :  { %s37_s9 = sshll.u32 %s925_s30, 4  ;;  %s20_s12 = sshll.u32 %s1282_s0, 4  ;;  %s38_s9 = int_to_ptr.vmem [resolvable:$true] %s37_s9  ;;  %s21_s12 = int_to_ptr.hbm [resolvable:$true] %s20_s12 }
   0x4   :  { %s926_s13 = smov 64   ;;  %s927_s14 = smov 4  }
   0x5   :  { %43 = dma.hbm_to_vmem [thread:$0]  %s36_s29, 256, %s38_s9, [#allocation6], %s926_s13, %s926_s13, %s927_s14  }
   0x6   :  { %s928_s15 = smov [#allocation2]   ;;  %s54_s19 = sshll.u32 %s1288_s6, 4  ;;  %s55_s19 = int_to_ptr.hbm [resolvable:$true] %s54_s19 }
   0x7   :  { %s22_s16 = sshll.u32 %s928_s15, 4  ;;  %s929_s2 = smov [#allocation7]   ;;  %s23_s16 = int_to_ptr.vmem [resolvable:$true] %s22_s16 }
   0x8   :  { %28 = dma.hbm_to_vmem [thread:$0]  %s21_s12, 512, %s23_s16, [#allocation3], %s926_s13, %s926_s13, %s927_s14  }
   0x9   :  { %s56_s20 = sshll.u32 %s929_s2, 4  ;;  %s57_s20 = int_to_ptr.vmem [resolvable:$true] %s56_s20 }
   0xa   :  { %62 = dma.hbm_to_vmem [thread:$0]  %s55_s19, 1024, %s57_s20, [#allocation6], %s926_s13, %s926_s13, %s927_s14  }
   0xb   :  { %919 = dma.done.wait [#allocation3], 512  }
   0xc   :  { %920 = vsyncadd [#allocation3], 4294966784 }
   0xd   :  { %921 = dma.done.wait [#allocation6], 1280  }
   0xe   :  { %922 = vsyncadd [#allocation6], 4294966016  ;;  %v930_v0 = vmov 0   ;;  %vm207_vm0 = vcmask 7168   ;;  %v96_v1 = vld [vmem:[%s1283_s1 + $0x10] sm:$0xff]  ;;  %v95_v2 = vld [vmem:[%s1283_s1 + $0x8] sm:$0xff] }
   0xf   :  { %803 = vset.pattern.permute.xlu0 %v930_v0  ;;  %802 = vset.pattern.permute.xlu2 %v930_v0  ;;  %v94_v3 = vld [vmem:[%s1283_s1] sm:$0xff]  ;;  %v222_v4 = vsel %vm207_vm0, %v96_v1, 0.0  ;;  %v215_v5 = vsel %vm207_vm0, %v95_v2, 0.0  ;;  %v97_v7 = vld [vmem:[%s1283_s1 + $0x18] sm:$0xff]  ;;  %v1009_v9 = vld [vmem:[%s1283_s1 + $0x30] sm:$0xff]  ;;  %vm150_vm1 = vcmask 261120  }
  0x10   :  { %801 = vset.pattern.permute.xlu1 %v930_v0  ;;  %114 = vperm.xlu0 %803, %v96_v1   ;;  %v208_v6 = vsel %vm207_vm0, %v94_v3, 0.0  ;;  %v1004_v8 = vld [vmem:[%s1283_s1 + $0x20] sm:$0xff]  ;;  %v223_v10 = vrot.slane %v222_v4, 4  ;;  %v216_v11 = vrot.slane %v215_v5, 4  ;;  %v229_v13 = vsel %vm207_vm0, %v97_v7, 0.0  ;;  %v99_v14 = vld [vmem:[%s1283_s1 + $0x28] sm:$0xff] }
  0x11   :  { %109 = vperm.xlu2 %802, %v95_v2   ;;  %104 = vperm.xlu1 %801, %v94_v3   ;;  %v209_v12 = vrot.slane %v208_v6, 4  ;;  %v230_v15 = vrot.slane %v229_v13, 4  ;;  %v236_v16 = vsel %vm207_vm0, %v1004_v8, 0.0  ;;  %v250_v17 = vsel %vm207_vm0, %v1009_v9, 0.0  ;;  %v101_v35 = vld [vmem:[%s1283_s1 + $0x38] sm:$0xff]  ;;  %v791_v3 = vld [vmem:[#allocation2 + $0x8] sm:$0xff]  }
  0x12   :  { %v243_v18 = vsel %vm207_vm0, %v99_v14, 0.0  ;;  %v224_v19 = vadd.f32 %v223_v10, %v222_v4  ;;  %v217_v20 = vadd.f32 %v216_v11, %v215_v5  ;;  %v237_v22 = vrot.slane %v236_v16, 4  ;;  %v776_v5 = vld [vmem:[#allocation2] sm:$0xff]   ;;  %s931_s29 = smov [#allocation8]   ;;  %s673_s11 = sshll.u32 %s1290_s8, 4  ;;  %s674_s11 = int_to_ptr.hbm [resolvable:$true] %s673_s11 }
  0x13   :  { %v210_v21 = vadd.f32 %v209_v12, %v208_v6  ;;  %v231_v23 = vadd.f32 %v230_v15, %v229_v13  ;;  %v251_v24 = vrot.slane %v250_v17, 4  ;;  %v244_v25 = vrot.slane %v243_v18, 4  ;;  %s671_s30 = sshll.u32 %s931_s29, 4  ;;  %s672_s30 = int_to_ptr.vmem [resolvable:$true] %s671_s30 }
  0x14   :  { %v225_v26 = vrot.slane %v224_v19, 2  ;;  %v218_v27 = vrot.slane %v217_v20, 2  ;;  %v238_v29 = vadd.f32 %v237_v22, %v236_v16  ;;  %v257_v44 = vsel %vm207_vm0, %v101_v35, 0.0 }
  0x15   :  { %v211_v28 = vrot.slane %v210_v21, 2  ;;  %v232_v30 = vrot.slane %v231_v23, 2  ;;  %v252_v31 = vadd.f32 %v251_v24, %v250_v17  ;;  %v245_v38 = vadd.f32 %v244_v25, %v243_v18 }
  0x16   :  { %v226_v32 = vadd.f32 %v225_v26, %v224_v19  ;;  %v239_v34 = vrot.slane %v238_v29, 2  ;;  %v219_v39 = vadd.f32 %v218_v27, %v217_v20  ;;  %v258_v52 = vrot.slane %v257_v44, 4 }
  0x17   :  { %v212_v33 = vadd.f32 %v211_v28, %v210_v21  ;;  %v233_v36 = vadd.f32 %v232_v30, %v231_v23  ;;  %v253_v37 = vrot.slane %v252_v31, 2  ;;  %v246_v51 = vrot.slane %v245_v38, 2  ;;  %v1032_v28 = vld [vmem:[#allocation2 + $0x18] sm:$0xff]  }
  0x18   :  { %v227_v40 = vrot.slane %v226_v32, 1  ;;  %v240_v42 = vadd.f32 %v239_v34, %v238_v29  ;;  %v220_v50 = vrot.slane %v219_v39, 1  ;;  %v259_v57 = vadd.f32 %v258_v52, %v257_v44 }
  0x19   :  { %119 = vperm.xlu2 %802, %v97_v7   ;;  %v213_v41 = vrot.slane %v212_v33, 1  ;;  %v234_v43 = vrot.slane %v233_v36, 1  ;;  %v254_v48 = vadd.f32 %v253_v37, %v252_v31  ;;  %v247_v56 = vadd.f32 %v246_v51, %v245_v38 }
  0x1a   :  { %v228_v45 = vadd.f32 %v227_v40, %v226_v32  ;;  %v241_v49 = vrot.slane %v240_v42, 1  ;;  %v221_v55 = vadd.f32 %v220_v50, %v219_v39  ;;  %v260_v60 = vrot.slane %v259_v57, 2 }
  0x1b   :  { %v214_v46 = vadd.f32 %v213_v41, %v212_v33  ;;  %v235_v47 = vadd.f32 %v234_v43, %v233_v36  ;;  %v255_v53 = vrot.slane %v254_v48, 1  ;;  %v248_v59 = vrot.slane %v247_v56, 1 }
  0x1c   :  { %276 = vperm.xlu1 %801, %v228_v45   ;;  %v242_v54 = vadd.f32 %v241_v49, %v240_v42  ;;  %v261_v62 = vadd.f32 %v260_v60, %v259_v57  ;;  %v782_v4 = vunpack.c.h.bf16 %v791_v3  ;;  %v778_v10 = vunpack.c.h.bf16 %v776_v5 }
  0x1d   :  { %266 = vperm.xlu0 %803, %v214_v46   ;;  %v256_v58 = vadd.f32 %v255_v53, %v254_v48  ;;  %v249_v61 = vadd.f32 %v248_v59, %v247_v56  ;;  %v781_v11 = vunpack.c.l.bf16 %v791_v3  ;;  %v777_v18 = vunpack.c.l.bf16 %v776_v5 }
  0x1e   :  { %v262_v63 = vrot.slane %v261_v62, 1 }
  0x20   :  { %v263_v0 = vadd.f32 %v262_v63, %v261_v62 }
  0x21   :  { %281 = vperm.xlu2 %802, %v235_v47  }
  0x24   :  { %286 = vperm.xlu1 %801, %v242_v54  }
  0x25   :  { %271 = vperm.xlu0 %803, %v221_v55  }
  0x29   :  { %296 = vperm.xlu2 %802, %v256_v58  }
  0x2c   :  { %124 = vperm.xlu1 %801, %v1004_v8  }
  0x2d   :  { %291 = vperm.xlu0 %803, %v249_v61  }
  0x31   :  { %134 = vperm.xlu2 %802, %v1009_v9  }
  0x34   :  { %301 = vperm.xlu1 %801, %v263_v0  }
  0x35   :  { %129 = vperm.xlu0 %803, %v99_v14  }
  0x3d   :  { %139 = vperm.xlu0 %803, %v101_v35   ;;  %v789_v35 = vunpack.c.l.bf16 %v1032_v28 }
  0x6b   :  { %v110_v1 = vpop.permute.xlu2 %109 }
  0x6c   :  { %v143_v13 = vmul.f32 %v778_v10, %v110_v1 }
  0x6e   :  { %v158_v19 = vsel %vm150_vm1, %v143_v13, 0.0 }
  0x6f   :  { %v159_v22 = vrot.slane %v158_v19, 4 }
  0x71   :  { %v160_v30 = vadd.f32 %v159_v22, %v158_v19 }
  0x73   :  { %v120_v2 = vpop.permute.xlu2 %119  ;;  %v161_v42 = vrot.slane %v160_v30, 2 }
  0x74   :  { %v145_v7 = vmul.f32 %v782_v4, %v120_v2  ;;  %v1069_v4 = vld [vmem:[#allocation2 + $0x10] sm:$0xff]  }
  0x75   :  { %v162_v52 = vadd.f32 %v161_v42, %v160_v30  ;;  %v785_v13 = vunpack.c.l.bf16 %v1069_v4  ;;  %v786_v22 = vunpack.c.h.bf16 %v1069_v4 }
  0x76   :  { %v172_v8 = vsel %vm150_vm1, %v145_v7, 0.0 }
  0x77   :  { %v173_v9 = vrot.slane %v172_v8, 4  ;;  %v163_v0 = vrot.slane %v162_v52, 1 }
  0x79   :  { %v174_v21 = vadd.f32 %v173_v9, %v172_v8  ;;  %v1085_v9 = vadd.f32 %v163_v0, %v162_v52  ;;  %v790_v0 = vunpack.c.h.bf16 %v1032_v28 }
  0x7b   :  { %v282_v6 = vpop.permute.xlu2 %281  ;;  %v175_v26 = vrot.slane %v174_v21, 2 }
  0x7c   :  { %807 = vrcp.f32 %v282_v6  ;;  %vm354_vm2 = vweird.f32 %v282_v6  ;;  %v360_v36 = vand.u32 2147483648, %v282_v6  ;;  %v358_v44 = vand.u32 2147483647, %v282_v6 }
  0x7d   :  { %v176_v33 = vadd.f32 %v175_v26, %v174_v21 }
  0x7e   :  { %v361_v48 = vor.u32 1.1754944e-38, %v360_v36  ;;  %vm359_vm5 = vcmp.eq.f32.partialorder %v358_v44, 8.507059e+37 }
  0x7f   :  { %v177_v46 = vrot.slane %v176_v33, 1 }
  0x81   :  { %v178_v54 = vadd.f32 %v177_v46, %v176_v33 }
  0x82   :  { %v808_v12 = vpop.eup %807  ;;  %v115_v15 = vpop.permute.xlu0 %114 }
  0x83   :  { %v1027_v16 = vpop.permute.xlu2 %296  ;;  %v350_v14 = vmul.f32 %v808_v12, %v282_v6  ;;  %v144_v17 = vmul.f32 %v781_v11, %v115_v15  ;;  %v105_v20 = vpop.permute.xlu1 %104  ;;  %vm355_vm3 = vweird.f32 %v808_v12 }
  0x84   :  { %809 = vrcp.f32 %v1027_v16  ;;  %v142_v25 = vmul.f32 %v777_v18, %v105_v20  ;;  %vm1044_vm4 = vmor %vm354_vm2, %vm355_vm3  ;;  %vm399_vm6 = vweird.f32 %v1027_v16  ;;  %v405_v6 = vand.u32 2147483648, %v1027_v16 }
  0x85   :  { %v351_v23 = vsub.f32 1.0, %v350_v14  ;;  %v165_v24 = vsel %vm150_vm1, %v144_v17, 0.0  ;;  %v403_v15 = vand.u32 2147483647, %v1027_v16 }
  0x86   :  { %v166_v27 = vrot.slane %v165_v24, 4  ;;  %v151_v32 = vsel %vm150_vm1, %v142_v25, 0.0  ;;  %v1092_v20 = vor.u32 1.1754944e-38, %v405_v6 }
  0x87   :  { %v352_v31 = vmul.f32 %v808_v12, %v351_v23  ;;  %v152_v39 = vrot.slane %v151_v32, 4  ;;  %vm1113_vm10 = vcmp.eq.f32.partialorder %v403_v15, 8.507059e+37 }
  0x88   :  { %v167_v37 = vadd.f32 %v166_v27, %v165_v24  ;;  %v758_v27 = vld [vmem:[#allocation5 + $0x8] sm:$0xff] }
  0x89   :  { %v353_v43 = vadd.f32 %v808_v12, %v352_v31  ;;  %v153_v51 = vadd.f32 %v152_v39, %v151_v32  ;;  %492 = vmatpush.bf16.msra.mxu0 %v758_v27  ;;  %v765_v27 = vld [vmem:[%s1286_s4 + $0x30] sm:$0xff] }
  0x8a   :  { %v1034_v29 = vpop.eup %809  ;;  %v168_v49 = vrot.slane %v167_v37, 2 }
  0x8b   :  { %v135_v34 = vpop.permute.xlu2 %134  ;;  %v395_v38 = vmul.f32 %v1034_v29, %v1027_v16  ;;  %v357_v53 = vsel %vm1044_vm4, %v808_v12, %v353_v43  ;;  %v154_v60 = vrot.slane %v153_v51, 2  ;;  %vm400_vm7 = vweird.f32 %v1034_v29 }
  0x8c   :  { %v148_v47 = vmul.f32 %v789_v35, %v135_v34  ;;  %v362_v57 = vsel %vm359_vm5, %v361_v48, %v357_v53  ;;  %v169_v58 = vadd.f32 %v168_v49, %v167_v37  ;;  %vm1080_vm8 = vmor %vm399_vm6, %vm400_vm7 }
  0x8d   :  { %v396_v50 = vsub.f32 1.0, %v395_v38  ;;  %v1071_v5 = vmul.f32 %v362_v57, %v178_v54  ;;  %v1078_v8 = vadd.f32 %v154_v60, %v153_v51  ;;  %v757_v38 = vld [vmem:[#allocation5] sm:$0xff] }
  0x8e   :  { %v1040_v40 = vpop.permute.xlu1 %276  ;;  %v193_v55 = vsel %vm150_vm1, %v148_v47, 0.0  ;;  %v170_v7 = vrot.slane %v169_v58, 1  ;;  %493 = vmatpush.bf16.msra.mxu0 %v757_v38 }
  0x8f   :  { %v1042_v41 = vpop.permute.xlu0 %266  ;;  %811 = vrcp.f32 %v1040_v40  ;;  %v397_v59 = vmul.f32 %v1034_v29, %v396_v50  ;;  %v194_v2 = vrot.slane %v193_v55, 4  ;;  %v427_v19 = vpack.c.bf16 %v1071_v5, %v1071_v5 }
  0x90   :  { %813 = vrcp.f32 %v1042_v41  ;;  %v343_v21 = vand.u32 2147483647, %v1040_v40  ;;  %v1096_v23 = vadd.f32 %v170_v7, %v169_v58  ;;  %v156_v24 = vrot.slane %v1078_v8, 1 }
  0x91   :  { %v1076_v10 = vadd.f32 %v1034_v29, %v397_v59  ;;  %v195_v14 = vadd.f32 %v194_v2, %v193_v55  ;;  %vm339_vm9 = vweird.f32 %v1040_v40  ;;  %v345_v35 = vand.u32 2147483648, %v1040_v40 }
  0x92   :  { %vm1117_vm11 = vcmp.eq.f32.partialorder %v343_v21, 8.507059e+37  ;;  %vm309_vm12 = vweird.f32 %v1042_v41  ;;  %v313_v43 = vand.u32 2147483647, %v1042_v41  ;;  %v315_v44 = vand.u32 2147483648, %v1042_v41 }
  0x93   :  { %v402_v16 = vsel %vm1080_vm8, %v1034_v29, %v1076_v10  ;;  %v196_v34 = vrot.slane %v195_v14, 2  ;;  %v346_v59 = vor.u32 1.1754944e-38, %v345_v35  ;;  %vm456_vm8 = vcmask 1041409   ;;  %v764_v10 = vld [vmem:[%s1286_s4 + $0x28] sm:$0xff] }
  0x94   :  { %v316_v60 = vor.u32 1.1754944e-38, %v315_v44  ;;  %vm314_vm6 = vcmp.eq.f32.partialorder %v313_v43, 8.507059e+37 }
  0x95   :  { %v1053_v56 = vpop.eup %811  ;;  %v1133_v57 = vadd.f32 %v196_v34, %v195_v14  ;;  %v1190_v34 = vsel %vm1113_vm10, %v1092_v20, %v402_v16 }
  0x96   :  { %v1056_v61 = vpop.permute.xlu1 %286  ;;  %v1060_v63 = vpop.eup %813  ;;  %v335_v1 = vmul.f32 %v1053_v56, %v1040_v40  ;;  %vm340_vm13 = vweird.f32 %v1053_v56 }
  0x97   :  { %v1058_v62 = vpop.permute.xlu0 %271  ;;  %815 = vrcp.f32 %v1056_v61  ;;  %v305_v3 = vmul.f32 %v1060_v63, %v1042_v41  ;;  %vm310_vm14 = vweird.f32 %v1060_v63  ;;  %vm1139_vm0 = vmor %vm339_vm9, %vm340_vm13  ;;  %v373_v14 = vand.u32 2147483647, %v1056_v61 }
  0x98   :  { %817 = vrcp.f32 %v1058_v62  ;;  %v336_v12 = vsub.f32 1.0, %v335_v1  ;;  %v330_v47 = vand.u32 2147483648, %v1058_v62  ;;  %v328_v51 = vand.u32 2147483647, %v1058_v62  ;;  %vm1146_vm2 = vmor %vm309_vm12, %vm310_vm14 }
  0x99   :  { %v306_v17 = vsub.f32 1.0, %v305_v3  ;;  %vm324_vm3 = vweird.f32 %v1058_v62  ;;  %v198_v38 = vrot.slane %v1133_v57, 1  ;;  %vm369_vm9 = vweird.f32 %v1056_v61 }
  0x9a   :  { %v337_v31 = vmul.f32 %v1053_v56, %v336_v12  ;;  %v331_v3 = vor.u32 1.1754944e-38, %v330_v47  ;;  %vm329_vm5 = vcmp.eq.f32.partialorder %v328_v51, 8.507059e+37  ;;  %vm458_vm14 = vcmask 1042434  }
  0x9b   :  { %v307_v36 = vmul.f32 %v1060_v63, %v306_v17 }
  0x9c   :  { %v338_v49 = vadd.f32 %v1053_v56, %v337_v31 }
  0x9d   :  { %v1088_v18 = vpop.eup %815  ;;  %v308_v52 = vadd.f32 %v1060_v63, %v307_v36 }
  0x9e   :  { %v125_v25 = vpop.permute.xlu1 %124  ;;  %v818_v30 = vpop.eup %817  ;;  %v365_v32 = vmul.f32 %v1088_v18, %v1056_v61  ;;  %v342_v12 = vsel %vm1139_vm0, %v1053_v56, %v338_v49  ;;  %vm370_vm7 = vweird.f32 %v1088_v18 }
  0x9f   :  { %v1104_v26 = vpop.permute.xlu0 %291  ;;  %v146_v33 = vmul.f32 %v785_v13, %v125_v25  ;;  %v320_v37 = vmul.f32 %v818_v30, %v1058_v62  ;;  %vm325_vm15 = vweird.f32 %v818_v30  ;;  %v766_v62 = vld [vmem:[%s1286_s4 + $0x38] sm:$0xff]  ;;  %v312_v13 = vsel %vm1146_vm2, %v1060_v63, %v308_v52  ;;  %vm1208_vm10 = vmor %vm369_vm9, %vm370_vm7 }
  0xa0   :  { %819 = vrcp.f32 %v1104_v26  ;;  %v366_v50 = vsub.f32 1.0, %v365_v32  ;;  %vm326_vm4 = vmor %vm324_vm3, %vm325_vm15  ;;  %569 = vmatpush.bf16.msra.mxu1 %v766_v62  ;;  %v347_v31 = vsel %vm1117_vm11, %v346_v59, %v342_v12  ;;  %v375_v63 = vand.u32 2147483648, %v1056_v61 }
  0xa1   :  { %v179_v45 = vsel %vm150_vm1, %v146_v33, 0.0  ;;  %v321_v46 = vsub.f32 1.0, %v320_v37  ;;  %vm1197_vm11 = vcmp.eq.f32.partialorder %v373_v14, 8.507059e+37  ;;  %v348_v11 = vmul.f32 %v347_v31, %v1096_v23 }
  0xa2   :  { %v180_v48 = vrot.slane %v179_v45, 4  ;;  %v367_v28 = vmul.f32 %v1088_v18, %v366_v50  ;;  %v376_v61 = vor.u32 1.1754944e-38, %v375_v63  ;;  %vm384_vm13 = vweird.f32 %v1104_v26  ;;  %v761_v63 = vld [vmem:[%s1286_s4 + $0x10] sm:$0xff] }
  0xa3   :  { %v322_v53 = vmul.f32 %v818_v30, %v321_v46  ;;  %v390_v46 = vand.u32 2147483648, %v1104_v26  ;;  %vm462_vm7 = vcmask 1044484   ;;  %vm464_vm9 = vcmask 1045509  }
  0xa4   :  { %v181_v54 = vadd.f32 %v180_v48, %v179_v45  ;;  %v368_v32 = vadd.f32 %v1088_v18, %v367_v28  ;;  %570 = vmatpush.bf16.msra.mxu1 %v765_v27  ;;  %v388_v45 = vand.u32 2147483647, %v1104_v26 }
  0xa5   :  { %v323_v2 = vadd.f32 %v818_v30, %v322_v53 }
  0xa6   :  { %v1131_v55 = vpop.eup %819  ;;  %v182_v6 = vrot.slane %v181_v54, 2  ;;  %v1151_v40 = vpop.permute.xlu1 %301  ;;  %v372_v39 = vsel %vm1208_vm10, %v1088_v18, %v368_v32  ;;  %v763_v18 = vld [vmem:[%s1286_s4 + $0x20] sm:$0xff]  ;;  %vm389_vm0 = vcmp.eq.f32.partialorder %v388_v45, 8.507059e+37  ;;  %v770_v45 = vld [vmem:[#allocation7 + $0x18] sm:$0xff] }
  0xa7   :  { %v130_v7 = vpop.permute.xlu0 %129  ;;  %v380_v41 = vmul.f32 %v1131_v55, %v1104_v26  ;;  %821 = vrcp.f32 %v1151_v40  ;;  %v327_v15 = vsel %vm326_vm4, %v818_v30, %v323_v2  ;;  %v317_v30 = vsel %vm314_vm6, %v316_v60, %v312_v13  ;;  %v806_v2 = vld [vmem:[%s1289_s7] ss:$0 sm:$0xff] }
  0xa8   :  { %v183_v56 = vadd.f32 %v182_v6, %v181_v54  ;;  %v332_v17 = vsel %vm329_vm5, %v331_v3, %v327_v15  ;;  %v147_v25 = vmul.f32 %v786_v22, %v130_v7  ;;  %v157_v22 = vadd.f32 %v156_v24, %v1078_v8  ;;  %571 = vmatpush.bf16.msra.mxu1 %v764_v10 }
  0xa9   :  { %v381_v21 = vsub.f32 1.0, %v380_v41  ;;  %v333_v35 = vmul.f32 %v332_v17, %v1085_v9  ;;  %vm385_vm12 = vweird.f32 %v1131_v55  ;;  %v377_v52 = vsel %vm1197_vm11, %v376_v61, %v372_v39  ;;  %v759_v39 = vld [vmem:[%s1286_s4] sm:$0xff] }
  0xaa   :  { %v184_v33 = vrot.slane %v183_v56, 1  ;;  %v186_v4 = vsel %vm150_vm1, %v147_v25, 0.0  ;;  %v318_v9 = vmul.f32 %v317_v30, %v157_v22  ;;  %v199_v60 = vadd.f32 %v198_v38, %v1133_v57  ;;  %vm1232_vm15 = vmor %vm384_vm13, %vm385_vm12  ;;  %v762_v57 = vld [vmem:[%s1286_s4 + $0x18] sm:$0xff] }
  0xab   :  { %v187_v36 = vrot.slane %v186_v4, 4  ;;  %v382_v29 = vmul.f32 %v1131_v55, %v381_v21  ;;  %v425_v23 = vpack.c.bf16 %v333_v35, %v333_v35  ;;  %v391_v7 = vor.u32 1.1754944e-38, %v390_v46  ;;  %v769_v46 = vld [vmem:[#allocation7 + $0x10] sm:$0xff] }
  0xac   :  { %v185_v42 = vadd.f32 %v184_v33, %v183_v56  ;;  %v424_v51 = vpack.c.bf16 %v318_v9, %v318_v9  ;;  %572 = vmatpush.bf16.msra.mxu1 %v763_v18  ;;  %vm414_vm3 = vweird.f32 %v1151_v40  ;;  %v420_v13 = vand.u32 2147483648, %v1151_v40 }
  0xad   :  { %v1193_v37 = vpop.eup %821  ;;  %v188_v43 = vadd.f32 %v187_v36, %v186_v4  ;;  %v383_v48 = vadd.f32 %v1131_v55, %v382_v29  ;;  %v449_v1 = vunpack.c.l.b16 %v425_v23  ;;  %v418_v15 = vand.u32 2147483647, %v1151_v40  ;;  %v771_v23 = vld [vmem:[#allocation7 + $0x20] sm:$0xff] }
  0xae   :  { %v410_v16 = vmul.f32 %v1193_v37, %v1151_v40  ;;  %v378_v58 = vmul.f32 %v377_v52, %v185_v42  ;;  %v448_v12 = vunpack.c.l.b16 %v424_v51  ;;  %vm415_vm2 = vweird.f32 %v1193_v37  ;;  %v774_v42 = vld [vmem:[#allocation7 + $0x38] sm:$0xff]  ;;  %v768_v52 = vld [vmem:[#allocation7 + $0x8] sm:$0xff] }
  0xaf   :  { %v140_v24 = vpop.permute.xlu0 %139  ;;  %v189_v49 = vrot.slane %v188_v43, 2  ;;  %v387_v6 = vsel %vm1232_vm15, %v1131_v55, %v383_v48  ;;  %v408_v21 = vmul.f32 %v1190_v34, %v199_v60  ;;  %vm1249_vm4 = vmor %vm414_vm3, %vm415_vm2  ;;  %vm460_vm5 = vcmask 1043459   ;;  %652 = vmatpush.bf16.msra.mxu2 %v774_v42 }
  0xb0   :  { %v149_v44 = vmul.f32 %v790_v0, %v140_v24  ;;  %v411_v47 = vsub.f32 1.0, %v410_v16  ;;  %v426_v0 = vpack.c.bf16 %v348_v11, %v348_v11  ;;  %v428_v62 = vpack.c.bf16 %v378_v58, %v378_v58  ;;  %573 = vmatpush.bf16.msra.mxu1 %v762_v57  ;;  %v760_v24 = vld [vmem:[%s1286_s4 + $0x8] sm:$0xff] }
  0xb1   :  { %v190_v59 = vadd.f32 %v189_v49, %v188_v43  ;;  %v392_v56 = vsel %vm389_vm0, %v391_v7, %v387_v6  ;;  %v457_v17 = vsel %vm456_vm8, %v449_v1, %v448_v12  ;;  %v421_v33 = vor.u32 1.1754944e-38, %v420_v13  ;;  %v773_v43 = vld [vmem:[#allocation7 + $0x30] sm:$0xff] }
  0xb2   :  { %v200_v50 = vsel %vm150_vm1, %v149_v44, 0.0  ;;  %v412_v53 = vmul.f32 %v1193_v37, %v411_v47  ;;  %v450_v25 = vunpack.c.l.b16 %v426_v0  ;;  %v452_v32 = vunpack.c.l.b16 %v428_v62  ;;  %v772_v44 = vld [vmem:[#allocation7 + $0x28] sm:$0xff]  ;;  %v804_v47 = vld [vmem:[%s1285_s3] ss:$0 sm:$0xff] }
  0xb3   :  { %v201_v54 = vrot.slane %v200_v50, 4  ;;  %v191_v26 = vrot.slane %v190_v59, 1  ;;  %v451_v34 = vunpack.c.l.b16 %v427_v19  ;;  %vm419_vm6 = vcmp.eq.f32.partialorder %v418_v15, 8.507059e+37  ;;  %653 = vmatpush.bf16.msra.mxu2 %v773_v43 }
  0xb4   :  { %v413_v28 = vadd.f32 %v1193_v37, %v412_v53  ;;  %v459_v22 = vsel %vm458_vm14, %v450_v25, %v457_v17  ;;  %v430_v36 = vpack.c.bf16 %v408_v21, %v408_v21  ;;  %574 = vmatpush.bf16.msra.mxu1 %v761_v63  ;;  %vm466_vm11 = vcmask 1046534   ;;  %v767_v53 = vld [vmem:[#allocation7] sm:$0xff] }
  0xb5   :  { %v202_v3 = vadd.f32 %v201_v54, %v200_v50  ;;  %v192_v55 = vadd.f32 %v191_v26, %v190_v59  ;;  %v461_v29 = vsel %vm460_vm5, %v451_v34, %v459_v22  ;;  %vm468_vm8 = vcmask 1047559   ;;  %v805_v54 = vld [vmem:[%s1287_s5] ss:$0 sm:$0xff] }
  0xb6   :  { %v417_v40 = vsel %vm1249_vm4, %v1193_v37, %v413_v28  ;;  %v463_v10 = vsel %vm462_vm7, %v452_v32, %v461_v29  ;;  %v454_v20 = vunpack.c.l.b16 %v430_v36 }
  0xb7   :  { %v203_v41 = vrot.slane %v202_v3, 2  ;;  %v393_v31 = vmul.f32 %v392_v56, %v192_v55  ;;  %v422_v38 = vsel %vm419_vm6, %v421_v33, %v417_v40  ;;  %654 = vmatpush.bf16.msra.mxu2 %v772_v44 }
  0xb8   :  { %575 = vmatpush.bf16.msra.mxu1 %v760_v24 }
  0xb9   :  { %v204_v14 = vadd.f32 %v203_v41, %v202_v3  ;;  %v429_v4 = vpack.c.bf16 %v393_v31, %v393_v31 }
  0xbb   :  { %v205_v30 = vrot.slane %v204_v14, 1  ;;  %v453_v8 = vunpack.c.l.b16 %v429_v4  ;;  %655 = vmatpush.bf16.msra.mxu2 %v771_v23 }
  0xbc   :  { %576 = vmatpush.bf16.msra.mxu1 %v759_v39 }
  0xbd   :  { %v206_v35 = vadd.f32 %v205_v30, %v204_v14  ;;  %v465_v9 = vsel %vm464_vm9, %v453_v8, %v463_v10 }
  0xbe   :  { %v467_v16 = vsel %vm466_vm11, %v454_v20, %v465_v9 }
  0xbf   :  { %v423_v37 = vmul.f32 %v422_v38, %v206_v35  ;;  %656 = vmatpush.bf16.msra.mxu2 %v770_v45 }
  0xc1   :  { %v431_v11 = vpack.c.bf16 %v423_v37, %v423_v37 }
  0xc3   :  { %v455_v61 = vunpack.c.l.b16 %v431_v11  ;;  %657 = vmatpush.bf16.msra.mxu2 %v769_v46 }
  0xc5   :  { %v469_v5 = vsel %vm468_vm8, %v455_v61, %v467_v16 }
  0xc6   :  { %v470_v19 = vpack.c.b16 %v469_v5, %v469_v5 }
  0xc7   :  { %658 = vmatpush.bf16.msra.mxu2 %v768_v52 }
  0xc8   :  { %692 = vmatmul.msk.bf16.vlgmr.msra.gmra.mxu0 %vm150_vm1, %v470_v19 }
  0xcb   :  { %659 = vmatpush.bf16.msra.mxu2 %v767_v53 }
 0x145   :  { %v495_v48 = vpop.f32.mrf.mxu0 }
 0x146   :  { %v496_v49 = vadd.f32 %v804_v47, %v495_v48 }
 0x148   :  { %v499_v50 = vmax.f32 %v496_v49, 0.0 }
 0x14a   :  { %v500_v18 = vpack.c.bf16 %v499_v50, %v499_v50 }
 0x14c   :  { %577 = vmatmul.bf16.vlgmr.msra.gmra.mxu1 %v500_v18 }
 0x14d   :  { %v497_v51 = vpop.f32.mrf.mxu0 }
 0x1c9   :  { %v578_v58 = vpop.f32.mrf.mxu1 }
 0x1ca   :  { %v579_v59 = vadd.f32 %v805_v54, %v578_v58 }
 0x1cc   :  { %v582_v60 = vmax.f32 %v579_v59, 0.0 }
 0x1ce   :  { %v583_v0 = vpack.c.bf16 %v582_v60, %v582_v60 }
 0x1d0   :  { %660 = vmatmul.bf16.vlgmr.msra.gmra.mxu2 %v583_v0 }
 0x1d1   :  { %v580_v1 = vpop.f32.mrf.mxu1 }
 0x253   :  { %v661_v3 = vpop.f32.mrf.mxu2 }
 0x254   :  { %v662_v6 = vadd.f32 %v806_v2, %v661_v3 }
 0x256   :  { %665 = vst [vmem:[#allocation8] sm:$0xff] %v662_v6 }
 0x257   :  { %676 = dma.vmem_to_hbm [thread:$0]  %s672_s30, 128, %s674_s11, [#allocation4]  }
 0x25b   :  { %v663_v7 = vpop.f32.mrf.mxu2 }
 0x25c   :  { %923 = dma.done.wait [#allocation4], 128  }
 0x25d   :  { %924 = vsyncadd [#allocation4], 4294967168 }
 0x25e   :  { %681 = vsyncpa [#allocation3], 1 }
 0x25f   :  { %682 = vsyncpa [#allocation6], 1 }
 0x260   :  { %683 = vsyncpa [#allocation4], 1 }

</bundles_post_ra>
